<compile_context>
chip_gen: v6e
topology: v6e:2x2x1
jax: 0.10.0
libtpu: 0.0.40
codegen_flags: <defaults>
</compile_context>

<pallas_src>
import jax
import jax.numpy as jnp
from jax.experimental import pallas as pl
from jax.experimental.pallas import tpu as pltpu


def _pow_static(x, p):
    """x ** p for a compile-time Python float p (x > 0).

    Small positive integer exponents use repeated multiplication (pure VPU,
    no EUP).  Anything else falls back to exp(p * log(x)).
    """
    p = float(p)
    if p == int(p) and 1 <= int(p) <= 16:
        n = int(p)
        result = None
        base = x
        while n:
            if n & 1:
                result = base if result is None else result * base
            n >>= 1
            if n:
                base = base * base
        return result
    return jnp.exp(p * jnp.log(x))


def _root(m, p, p_is_static):
    """m ** (1/p) for strictly positive m (only B*C elements; negligible)."""
    if p_is_static:
        return jnp.exp(jnp.log(m) * (1.0 / float(p)))
    return jnp.exp(jnp.log(m) * (1.0 / p))


def _gem_body(p_val, x_ref, o_ref, acc_ref, *, eps, inv_area, tile_s, s_valid,
              num_s, p_is_static, trans_dtype):
    """One grid step: row-tile i (axis 0), spatial-tile s (axis 1)."""
    xc = jnp.maximum(x_ref[...].astype(jnp.float32), eps)   # clamp(min=eps) > 0

    if p_is_static:
        xp = _pow_static(xc, p_val)                          # VPU only
    elif trans_dtype == jnp.float32:
        xp = jnp.exp(p_val * jnp.log(xc))                    # EUP, f32
    else:
        # bf16 EUP mode (v6e/v7x only): ~2x transcendental rate, ~1e-3 rel err.
        xp = jnp.exp(p_val.astype(trans_dtype)
                     * jnp.log(xc.astype(trans_dtype))).astype(jnp.float32)

    if num_s == 1:
        # Whole spatial extent in one tile: reduce and write directly,
        # no cross-step scratch needed.
        m = jnp.sum(xp, axis=-1, keepdims=True) * inv_area
        o_ref[...] = _root(m, p_val, p_is_static).astype(o_ref.dtype)
        return

    s = pl.program_id(1)

    @pl.when(s == 0)
    def _init():
        acc_ref[...] = jnp.zeros_like(acc_ref)

    def accumulate(vals):
        # vals: (tile_bc, tile_s), tile_s % 128 == 0 (enforced by wrapper).
        # Fold lane groups with pure per-lane VPU adds into the wide
        # (tile_bc, 128) accumulator; no cross-lane reduce per step.
        part = vals[:, 0:128]
        for f in range(1, tile_s // 128):
            part = part + vals[:, f * 128:(f + 1) * 128]
        acc_ref[...] += part

    if s_valid is None:
        accumulate(xp)
    else:
        # Only the last spatial tile is ragged: keep the mask off the hot path.
        @pl.when(s < num_s - 1)
        def _hot():
            accumulate(xp)

        @pl.when(s == num_s - 1)
        def _ragged():
            lane = jax.lax.broadcasted_iota(jnp.int32, xp.shape, 1) + s * tile_s
            accumulate(jnp.where(lane < s_valid, xp, 0.0))

    @pl.when(s == num_s - 1)
    def _finalize():
        m = jnp.sum(acc_ref[...], axis=-1, keepdims=True) * inv_area
        o_ref[...] = _root(m, p_val, p_is_static).astype(o_ref.dtype)


def _vmem_budget_bytes():
    """(double-buffered working-set budget, scoped vmem limit) per chip."""
    cap = 64 * 1024 * 1024                      # conservative default = v7x
    try:
        info = pltpu.get_tpu_info()
        for name in ("vmem_capacity_bytes", "vmem_size_bytes", "vmem_bytes"):
            v = getattr(info, name, None)
            if v:
                cap = int(v)
                break
    except Exception:
        pass
    if cap >= 128 * 1024 * 1024:                # v5e / v6e: 128 MiB physical
        return 28 * 1024 * 1024, 64 * 1024 * 1024
    # v7x: 64 MiB physical (32 MiB default scoped) -> stay well clear.
    return 16 * 1024 * 1024, 48 * 1024 * 1024


def gem_pallas(x, p, eps=1e-6, *, max_tile_rows=16384, max_tile_s=2048,
               transcendental_dtype=jnp.float32):
    """GeM pooling.

    x : (B, C, H, W)
    p : Python scalar (static fast path, matches frozen nn.Parameter) or a
        shape-(1,) f32 array (runtime p, lives in SMEM).
    Returns (B, C) in x.dtype.
    """
    B, C, H, W = x.shape
    N = B * C
    S = H * W
    x2 = x.reshape(N, S)                        # contiguous view: rows x spatial
    in_itemsize = x2.dtype.itemsize
    out_itemsize = x.dtype.itemsize

    p_is_static = isinstance(p, (int, float))
    if p_is_static:
        p_val = float(p)
    else:
        p_arr = jnp.asarray(p, jnp.float32).reshape((1,))

    # ---- spatial (reduction) tiling -------------------------------------
    max_tile_s = max(128, (max_tile_s // 128) * 128)    # lane folds need /128
    if S <= max_tile_s:
        tile_s, grid_s = S, 1                           # full extent, no mask
    else:
        tile_s = max_tile_s
        grid_s = pl.cdiv(S, tile_s)
    s_valid = S if (grid_s > 1 and tile_s * grid_s != S) else None

    # ---- row tiling: fill the per-chip VMEM budget -----------------------
    budget, vmem_limit = _vmem_budget_bytes()
    max_tile_rows = max(8, (max_tile_rows // 8) * 8)
    bytes_per_row = (2 * tile_s * in_itemsize           # double-buffered input
                     + 2 * 128 * out_itemsize           # lane-padded out block
                     + (128 * 4 if grid_s > 1 else 0))  # f32 wide accumulator
    rows = budget // bytes_per_row
    rows = min(max(8, (rows // 8) * 8), max_tile_rows)
    if N <= rows:
        tile_bc, grid_bc = N, 1                         # one full-extent block
    else:
        tile_bc, grid_bc = rows, pl.cdiv(N, rows)       # last block may be ragged

    statics = dict(eps=float(eps), inv_area=1.0 / float(S), tile_s=tile_s,
                   s_valid=s_valid, num_s=grid_s, p_is_static=p_is_static,
                   trans_dtype=transcendental_dtype)

    x_spec = pl.BlockSpec((tile_bc, tile_s), lambda i, s: (i, s))
    o_spec = pl.BlockSpec((tile_bc, 1), lambda i, s: (i, 0))
    scratch_shapes = ([pltpu.VMEM((tile_bc, 128), jnp.float32)]
                      if grid_s > 1 else [])

    if p_is_static:
        if grid_s > 1:
            def kernel(x_ref, o_ref, acc_ref):
                _gem_body(p_val, x_ref, o_ref, acc_ref, **statics)
        else:
            def kernel(x_ref, o_ref):
                _gem_body(p_val, x_ref, o_ref, None, **statics)
        in_specs = [x_spec]
        inputs = (x2,)
        flops = 5 * N * S
        transcendentals = 2 * N
        bytes_accessed = N * S * in_itemsize + N * out_itemsize
    else:
        if grid_s > 1:
            def kernel(p_ref, x_ref, o_ref, acc_ref):
                _gem_body(p_ref[0], x_ref, o_ref, acc_ref, **statics)
        else:
            def kernel(p_ref, x_ref, o_ref):
                _gem_body(p_ref[0], x_ref, o_ref, None, **statics)
        in_specs = [pl.BlockSpec(memory_space=pltpu.SMEM), x_spec]
        inputs = (p_arr, x2)
        flops = 3 * N * S
        transcendentals = 2 * N * S + 2 * N
        bytes_accessed = N * S * in_itemsize + N * out_itemsize + 4

    grid_spec = pltpu.PrefetchScalarGridSpec(
        num_scalar_prefetch=0,
        grid=(grid_bc, grid_s),
        in_specs=in_specs,
        out_specs=o_spec,
        scratch_shapes=scratch_shapes,
    )

    out = pl.pallas_call(
        kernel,
        out_shape=jax.ShapeDtypeStruct((N, 1), x.dtype),
        grid_spec=grid_spec,
        compiler_params=pltpu.CompilerParams(
            # TODO(synk): on v7x verify via xprof that the row axis is split
            # across both TensorCores; if not, switch to pltpu.CORE_PARALLEL.
            dimension_semantics=("parallel", "arbitrary"),
            vmem_limit_bytes=vmem_limit,
        ),
        cost_estimate=pl.CostEstimate(
            flops=flops,
            transcendentals=transcendentals,
            bytes_accessed=bytes_accessed,
        ),
    )(*inputs)
    return out.reshape(B, C)


def gem_reference(x, p, eps=1e-6):
    """Pure-JAX reference matching the PyTorch module."""
    p = jnp.asarray(p, jnp.float32).reshape(-1)[0]
    xc = jnp.maximum(x.astype(jnp.float32), eps)
    out = jnp.mean(xc ** p, axis=(-2, -1)) ** (1.0 / p)
    return out.astype(x.dtype)


if __name__ == "__main__":
    key = jax.random.PRNGKey(0)

    # Primary example (small NCHW shape, as the module expects).
    B, C, H, W = 2, 4, 16, 16
    x = jax.random.uniform(key, (B, C, H, W), dtype=jnp.float32)

    # Module default: p = nn.Parameter(ones(1) * 3, requires_grad=False).
    p_arr = jnp.ones((1,), dtype=jnp.float32) * 3.0
    ref = gem_reference(x, p_arr, eps=1e-6)

    # 1) Runtime-p path (p in SMEM, exp(p*log(x)) on the EUP).
    out_dyn = jax.block_until_ready(gem_pallas(x, p_arr, eps=1e-6))
    assert out_dyn.shape == (B, C)
    assert jnp.allclose(out_dyn, ref, rtol=1e-5, atol=1e-5), (out_dyn, ref)

    # 2) Static-p fast path (frozen p=3 -> repeated multiplies, no EUP).
    out_sta = jax.block_until_ready(gem_pallas(x, 3.0, eps=1e-6))
    assert out_sta.shape == (B, C)
    assert jnp.allclose(out_sta, ref, rtol=1e-5, atol=1e-5), (out_sta, ref)

    # 3) Multi-tile paths: ragged row blocks, spatial reduction split across
    #    grid steps, wide accumulator + cold-path lane mask (runtime p).
    B2, C2, H2, W2 = 3, 5, 20, 20            # N=15 (not /8), S=400 (not /128)
    xb = jax.random.uniform(jax.random.PRNGKey(1), (B2, C2, H2, W2), jnp.float32)
    ref2 = gem_reference(xb, p_arr, eps=1e-6)
    out2 = jax.block_until_ready(
        gem_pallas(xb, p_arr, eps=1e-6, max_tile_rows=8, max_tile_s=128))
    assert out2.shape == (B2, C2)
    assert jnp.allclose(out2, ref2, rtol=1e-5, atol=1e-5), (out2, ref2)

    # 4) Same shapes, static p, two 128-lane folds per step (tile_s=256).
    out3 = jax.block_until_ready(
        gem_pallas(xb, 3.0, eps=1e-6, max_tile_rows=8, max_tile_s=256))
    assert jnp.allclose(out3, ref2, rtol=1e-5, atol=1e-5), (out3, ref2)

    print("KERNEL_OK")
</pallas_src>

<mosaic_0001>
module attributes {stable_mosaic.version = 11 : i64} {
  func.func @kernel(%arg0: i32, %arg1: i32, %arg2: memref<1xf32, #tpu.memory_space<smem>>, %arg3: memref<8x256xf32, #tpu.memory_space<vmem>>, %arg4: memref<8x1xf32, #tpu.memory_space<vmem>>) attributes {dimension_semantics = [#tpu.dimension_semantics<parallel>, #tpu.dimension_semantics<arbitrary>], iteration_bounds = array<i64: 1, 1>, scalar_prefetch = 0 : i64, scratch_operands = 0 : i64, tpu.core_type = #tpu.core_type<tc>, window_params = [{transform_indices = @transform_0, window_bounds = array<i64: 1>}, {transform_indices = @transform_1, window_bounds = array<i64: 8, 256>}, {transform_indices = @transform_2, window_bounds = array<i64: 8, 1>}]} {
    %c0 = arith.constant 0 : index
    %0 = memref.load %arg2[%c0] : memref<1xf32, #tpu.memory_space<smem>>
    %c0_0 = arith.constant 0 : index
    %c0_1 = arith.constant 0 : index
    %1 = vector.load %arg3[%c0_0, %c0_1] : memref<8x256xf32, #tpu.memory_space<vmem>>, vector<8x256xf32>
    %cst = arith.constant 9.99999997E-7 : f32
    %2 = vector.broadcast %cst : f32 to vector<8x256xf32>
    %3 = arith.maximumf %1, %2 : vector<8x256xf32>
    %4 = math.log %3 : vector<8x256xf32>
    %5 = vector.broadcast %0 : f32 to vector<8x256xf32>
    %6 = arith.mulf %5, %4 : vector<8x256xf32>
    %7 = math.exp %6 : vector<8x256xf32>
    %cst_2 = arith.constant dense<0.000000e+00> : vector<8xf32>
    %8 = vector.multi_reduction <add>, %7, %cst_2 [1] : vector<8x256xf32> to vector<8xf32>
    %9 = vector.shape_cast %8 : vector<8xf32> to vector<8x1xf32>
    %cst_3 = arith.constant 3.906250e-03 : f32
    %10 = vector.broadcast %cst_3 : f32 to vector<8x1xf32>
    %11 = arith.mulf %9, %10 : vector<8x1xf32>
    %12 = math.log %11 : vector<8x1xf32>
    %cst_4 = arith.constant 1.000000e+00 : f32
    %13 = arith.divf %cst_4, %0 : f32
    %14 = vector.broadcast %13 : f32 to vector<8x1xf32>
    %15 = arith.mulf %12, %14 : vector<8x1xf32>
    %16 = math.exp %15 : vector<8x1xf32>
    %c0_5 = arith.constant 0 : index
    %c0_6 = arith.constant 0 : index
    %17 = vector.load %arg4[%c0_5, %c0_6] : memref<8x1xf32, #tpu.memory_space<vmem>>, vector<8x1xf32>
    tpu.vector_store %arg4[%c0_5, %c0_6], %16 {strides = array<i32>} : memref<8x1xf32, #tpu.memory_space<vmem>>, vector<8x1xf32>,
    return
  }
  func.func @transform_0(%arg0: i32, %arg1: i32) -> i32 {
    %c0_i32 = arith.constant 0 : i32
    %c0_i32_0 = arith.constant 0 : i32
    return %c0_i32 : i32
  }
  func.func @transform_1(%arg0: i32, %arg1: i32) -> (i32, i32) {
    %c0_i32 = arith.constant 0 : i32
    return %arg0, %arg1 : i32, i32
  }
  func.func @transform_2(%arg0: i32, %arg1: i32) -> (i32, i32) {
    %c0_i32 = arith.constant 0 : i32
    %c0_i32_0 = arith.constant 0 : i32
    return %arg0, %c0_i32 : i32, i32
  }
}

</mosaic_0001>

<bundles_post_ra>
// kernel: tpu_custom_call.1
= control target key start
LH: loop header
LB: loop body
LE: loop exit
PB: predicated region body
PF: predicated region fallthrough
CT: control target
= control target key end

     0   :  { %8 = vsyncpa [#allocation4], 0  ;;  %s99_s9 = smov [#allocation3]   ;;  %s124_s0 = inlined_call_operand.<no memory space> [shape: f32[1], index: 0, kind: input, shape index: {}]   ;;  %s125_s1 = inlined_call_operand.hbm [shape: f32[8,256], index: 1, kind: input, shape index: {}]   ;;  %s126_s2 = inlined_call_operand.vmem [shape: f32[8,1], index: 2, kind: output, shape index: {}]  }
   0x1   :  { %s17_s10 = sshll.u32 %s99_s9, 4  ;;  %s18_s10 = int_to_ptr.vmem [resolvable:$true] %s17_s10 }
   0x2   :  { %s85_s11 = scalar_lea.vmem %s18_s10, 256  ;;  %p90_p1 = scmp.lt.s32.totalorder %s18_s10, %s18_s10 }
   0x3   :  { %p86_p0 = scmp.ne.s32.totalorder %s18_s10, %s85_s11  ;;  %p91_p2 = scmp.lt.s32.totalorder %s85_s11, %s85_s11 }
   0x5   :  { %p92_p3 = por %p91_p2, %p90_p1 }
   0x7   :  { %p93_p4 = pnand %p92_p3, %p86_p0 }
   0x9   :  { %96 = shalt.err (!%p93_p4)
}
   0xa   :  { %20 = dma.hbm_to_vmem [thread:$0]  %s125_s1, 256, %s18_s10, [#allocation4]  }
   0xb   :  { %97 = dma.done.wait [#allocation4], 256  }
   0xc   :  { %98 = vsyncadd [#allocation4], 4294967040  ;;  %v33_v0 = vstv %s124_s0  ;;  %v25_v1 = vld [vmem:[#allocation3] sm:$0xff]  ;;  %v26_v2 = vld [vmem:[#allocation3 + $0x8] sm:$0xff]  ;;  %vm53_vm0 = vcmask 7168  }
   0xd   :  { %63 = vrcp.f32 %v33_v0  ;;  %v27_v3 = vmax.f32 %v25_v1, 1e-06  ;;  %v28_v4 = vmax.f32 %v26_v2, 1e-06 }
   0xf   :  { %65 = vlog2.f32 %v27_v3 }
  0x10   :  { %67 = vlog2.f32 %v28_v4 }
  0x1a   :  { %v64_v5 = vpop.eup %63 }
  0x1b   :  { %60 = vpush %v64_v5 }
  0x1c   :  { %v66_v6 = vpop.eup %65 }
  0x1d   :  { %v68_v7 = vpop.eup %67  ;;  %v30_v8 = vmul.f32 0.6931472, %v66_v6 }
  0x1e   :  { %v32_v9 = vmul.f32 0.6931472, %v68_v7 }
  0x1f   :  { %v34_v10 = vmul.f32 %v33_v0, %v30_v8 }
  0x20   :  { %v35_v11 = vmul.f32 %v33_v0, %v32_v9 }
  0x21   :  { %v36_v12 = vmul.f32 1.442695, %v34_v10 }
  0x22   :  { %v38_v13 = vmul.f32 1.442695, %v35_v11 }
  0x23   :  { %69 = vpow2.f32 %v36_v12 }
  0x24   :  { %71 = vpow2.f32 %v38_v13 }
  0x30   :  { %v70_v14 = vpop.eup %69 }
  0x31   :  { %v72_v15 = vpop.eup %71 }
  0x32   :  { %v40_v16 = vadd.f32 %v72_v15, %v70_v14 }
  0x34   :  { %41 = vadd.xlane.f32.xlu0 %v40_v16 }
  0x4c   :  { %s61_s0 = spop %60 }
  0x4d   :  { %v49_v20 = vstv %s61_s0 }
  0xbd   :  { %v42_v17 = vpop.xlane.xlu0 %41 }
  0xbe   :  { %v43_v18 = vmul.f32 0.00390625, %v42_v17 }
  0xc0   :  { %73 = vlog2.f32 %v43_v18 }
  0xcd   :  { %v74_v19 = vpop.eup %73 }
  0xce   :  { %v45_v21 = vmul.f32 0.6931472, %v74_v19 }
  0xd0   :  { %v50_v22 = vmul.f32 %v49_v20, %v45_v21 }
  0xd2   :  { %v51_v23 = vmul.f32 1.442695, %v50_v22 }
  0xd4   :  { %75 = vpow2.f32 %v51_v23 }
  0xe1   :  { %v76_v24 = vpop.eup %75 }
  0xe2   :  { %54 = vst.msk [vmem:[%s126_s2] sm:$0xff] %vm53_vm0, %v76_v24 }
  0xe3   :  { %59 = vsyncpa [#allocation4], 1 }

</bundles_post_ra>
